<compile_context>
chip_gen: v7x
topology: tpu7x:2x2x1
jax: 0.10.0
libtpu: 0.0.40
codegen_flags: <defaults>
</compile_context>

<pallas_src>
import functools

import jax
import jax.numpy as jnp
from jax import lax
from jax.experimental import pallas as pl
from jax.experimental.pallas import tpu as pltpu

_LANES = 128
_SUBLANES = 8


def _pow(x, p_exp):
    """x ** p_exp without transcendental lowering for integer exponents."""
    if isinstance(p_exp, int):
        if p_exp == 1:
            return x
        if p_exp == 2:
            return x * x
        return lax.integer_pow(x, p_exp)
    return jnp.power(x, jnp.float32(p_exp))


def _dice_kernel(p_ref, t_ref, loss_ref, acc_num, acc_den, *,
                 smooth, p_exp, k_valid, tk, need_mask, binary_target):
    k = pl.program_id(1)

    @pl.when(k == 0)
    def _():
        acc_num[...] = jnp.zeros_like(acc_num)
        acc_den[...] = jnp.zeros_like(acc_den)

    p = p_ref[...].astype(jnp.float32)   # (bb, tk)
    t = t_ref[...].astype(jnp.float32)

    if need_mask:
        # Only the last feature tile has columns past K; the mask is a few
        # VALU ops per element and hides under the DMA on every generation.
        col = k * tk + lax.broadcasted_iota(jnp.int32, p.shape, dimension=1)
        valid = col < k_valid
        zero = jnp.float32(0.0)
        p = jnp.where(valid, p, zero)
        t = jnp.where(valid, t, zero)

    pw = _pow(p, p_exp)
    tw = t if binary_target else _pow(t, p_exp)

    # Per-step reduce over the feature axis (VALU vreg adds + one XLU fold);
    # the kernel is HBM-bound with large VALU/XLU slack, so this is hidden.
    acc_num[...] += jnp.sum(p * t, axis=1, keepdims=True)    # (bb, 1)
    acc_den[...] += jnp.sum(pw + tw, axis=1, keepdims=True)  # (bb, 1)

    @pl.when(k == pl.num_programs(1) - 1)
    def _():
        num = acc_num[...] * 2.0 + jnp.float32(smooth)
        den = acc_den[...] + jnp.float32(smooth)
        loss = 1.0 - num / den                                # (bb, 1)
        loss_ref[...] = jnp.broadcast_to(loss, loss_ref.shape)


def dice_loss(predict, target, *, smooth=1.0, p=2, reduction="mean",
              loss_weight=1.0, binary_target=False,
              target_block_bytes=4 * 1024 * 1024):
    """Pallas implementation of mmdet DiceLoss.forward (numeric loss_weight).

    binary_target=True may be passed when `target` is a {0,1} mask (t**p == t),
    which saves per-element VALU work and allows a bf16/int8 target.
    """
    assert predict.shape[0] == target.shape[0], \
        "predict & target batch size don't match"
    if not p > 0:
        # Tail masking (and any zero-valued padding) relies on 0**p == 0.
        raise ValueError("dice_loss requires p > 0, got {}".format(p))

    B = predict.shape[0]
    pred2d = predict.reshape(B, -1)
    targ2d = target.reshape(B, -1)
    K = pred2d.shape[1]
    assert targ2d.shape[1] == K, "predict & target feature size don't match"

    p_item = jnp.dtype(pred2d.dtype).itemsize
    t_item = jnp.dtype(targ2d.dtype).itemsize
    itemsize = max(p_item, t_item)

    # ---- Block sizing -------------------------------------------------------
    elems_budget = max(_SUBLANES * _LANES, target_block_bytes // itemsize)
    row_lanes = pl.cdiv(K, _LANES)                # lane groups per batch row
    bb_full = max(1, elems_budget // (row_lanes * _LANES))

    # Batch rows per block (second-to-last block dim must be a multiple of 8
    # or equal to the full batch dim).
    if B <= _SUBLANES:
        bb = B
    elif bb_full < B:
        bb = max(_SUBLANES, (bb_full // _SUBLANES) * _SUBLANES)
    elif B >= 16:
        # Whole batch fits the budget; keep >=2 batch blocks so the "parallel"
        # batch axis can still be megacore-sharded on v7x.
        bb = ((B + 1) // 2 + _SUBLANES - 1) // _SUBLANES * _SUBLANES
    else:
        bb = B

    # Feature tile: multiple of 128 lanes, or the exact row length when one
    # tile covers the whole row (then no in-kernel mask is needed).
    tk_lanes = max(1, min(row_lanes, elems_budget // (bb * _LANES)))
    if tk_lanes >= row_lanes:
        tk = K
    else:
        tk = tk_lanes * _LANES
    n_b = pl.cdiv(B, bb)
    n_k = pl.cdiv(K, tk)
    need_mask = (K % tk) != 0

    # ---- VMEM budget (derived from actual pipeline footprint) ---------------
    bb_pad = pl.cdiv(bb, _SUBLANES) * _SUBLANES
    tk_pad = pl.cdiv(tk, _LANES) * _LANES
    block_elems = bb_pad * tk_pad
    pipeline_bytes = 2 * block_elems * (p_item + t_item)   # 2 bufs x 2 inputs
    vmem_limit = int(pipeline_bytes + 2 * 1024 * 1024)     # out/scratch slack
    vmem_limit = max(4 * 1024 * 1024, min(vmem_limit, 128 * 1024 * 1024))

    kernel = functools.partial(
        _dice_kernel, smooth=float(smooth), p_exp=p, k_valid=K, tk=tk,
        need_mask=need_mask, binary_target=binary_target)

    per_batch = pl.pallas_call(
        kernel,
        out_shape=jax.ShapeDtypeStruct((B, _LANES), jnp.float32),
        grid_spec=pltpu.PrefetchScalarGridSpec(
            num_scalar_prefetch=0,
            grid=(n_b, n_k),
            in_specs=[
                pl.BlockSpec((bb, tk), lambda b, k: (b, k)),
                pl.BlockSpec((bb, tk), lambda b, k: (b, k)),
            ],
            out_specs=pl.BlockSpec((bb, _LANES), lambda b, k: (b, 0)),
            scratch_shapes=[
                pltpu.VMEM((bb, 1), jnp.float32),
                pltpu.VMEM((bb, 1), jnp.float32),
            ],
        ),
        compiler_params=pltpu.CompilerParams(
            dimension_semantics=("parallel", "arbitrary"),
            vmem_limit_bytes=vmem_limit,
        ),
    )(pred2d, targ2d)

    loss = per_batch[:, 0]  # (B,)

    # TODO(synk): 'auto'/'auto2' loss_weight modes (learned Auto_loss_weight
    # parameter) are training-time scalar epilogues; only numeric loss_weight
    # is implemented here.
    if reduction == "mean":
        return loss_weight * jnp.mean(loss)
    elif reduction == "sum":
        return loss_weight * jnp.sum(loss)
    elif reduction == "none":
        return loss_weight * loss
    else:
        raise Exception("Unexpected reduction {}".format(reduction))


def dice_loss_ref(predict, target, *, smooth=1.0, p=2, reduction="mean",
                  loss_weight=1.0):
    B = predict.shape[0]
    pr = predict.reshape(B, -1).astype(jnp.float32)
    tg = target.reshape(B, -1).astype(jnp.float32)
    num = jnp.sum(pr * tg, axis=1) * 2 + smooth
    den = jnp.sum(pr ** p + tg ** p, axis=1) + smooth
    loss = 1 - num / den
    if reduction == "mean":
        return loss_weight * jnp.mean(loss)
    elif reduction == "sum":
        return loss_weight * jnp.sum(loss)
    return loss_weight * loss


if __name__ == "__main__":
    key = jax.random.PRNGKey(0)
    k1, k2, k3, k4 = jax.random.split(key, 4)

    # Test 1: lane-aligned feature size, mean reduction.
    B, C, H, W = 2, 4, 16, 16
    predict = jax.nn.sigmoid(jax.random.normal(k1, (B, C, H, W), jnp.float32))
    target = (jax.random.uniform(k2, (B, C, H, W)) > 0.5).astype(jnp.float32)

    out = dice_loss(predict, target, smooth=1.0, p=2,
                    reduction="mean", loss_weight=1.0)
    out = jax.block_until_ready(out)
    ref = dice_loss_ref(predict, target, smooth=1.0, p=2,
                        reduction="mean", loss_weight=1.0)
    assert jnp.allclose(out, ref, atol=1e-5, rtol=1e-5), (out, ref)

    # Test 2: unaligned K exercises the in-kernel tail mask (no HBM pad copy),
    # reduction='none' exercises the per-batch output.
    B2, C2, H2, W2 = 2, 3, 7, 11
    predict2 = jax.nn.sigmoid(jax.random.normal(k3, (B2, C2, H2, W2), jnp.float32))
    target2 = (jax.random.uniform(k4, (B2, C2, H2, W2)) > 0.5).astype(jnp.float32)

    out2 = dice_loss(predict2, target2, smooth=1.0, p=2,
                     reduction="none", loss_weight=1.0)
    out2 = jax.block_until_ready(out2)
    ref2 = dice_loss_ref(predict2, target2, smooth=1.0, p=2,
                         reduction="none", loss_weight=1.0)
    assert jnp.allclose(out2, ref2, atol=1e-5, rtol=1e-5), (out2, ref2)

    # Test 3: bf16 binary target + binary_target fast path (t**2 == t exactly
    # for {0,1} masks, and bf16 represents 0/1 exactly).
    target3 = target.astype(jnp.bfloat16)
    out3 = dice_loss(predict, target3, smooth=1.0, p=2, reduction="sum",
                     loss_weight=0.5, binary_target=True)
    out3 = jax.block_until_ready(out3)
    ref3 = dice_loss_ref(predict, target, smooth=1.0, p=2,
                         reduction="sum", loss_weight=0.5)
    assert jnp.allclose(out3, ref3, atol=1e-5, rtol=1e-5), (out3, ref3)

    print("KERNEL_OK")
</pallas_src>

<mosaic_0001>
module attributes {stable_mosaic.version = 11 : i64} {
  func.func @_dice_kernel(%arg0: i32, %arg1: i32, %arg2: memref<2x1024xf32, #tpu.memory_space<vmem>>, %arg3: memref<2x1024xf32, #tpu.memory_space<vmem>>, %arg4: memref<2x128xf32, #tpu.memory_space<vmem>>, %arg5: memref<2x1xf32, #tpu.memory_space<vmem>>, %arg6: memref<2x1xf32, #tpu.memory_space<vmem>>) attributes {dimension_semantics = [#tpu.dimension_semantics<parallel>, #tpu.dimension_semantics<arbitrary>], iteration_bounds = array<i64: 1, 1>, scalar_prefetch = 0 : i64, scratch_operands = 2 : i64, tpu.core_type = #tpu.core_type<tc>, window_params = [{transform_indices = @transform_0, window_bounds = array<i64: 2, 1024>}, {transform_indices = @transform_1, window_bounds = array<i64: 2, 1024>}, {transform_indices = @transform_2, window_bounds = array<i64: 2, 128>}]} {
    %c0_i32 = arith.constant 0 : i32
    %0 = arith.cmpi eq, %arg1, %c0_i32 : i32
    %1 = arith.extui %0 : i1 to i32
    %c0_i32_0 = arith.constant 0 : i32
    %2 = arith.cmpi ne, %1, %c0_i32_0 : i32
    scf.if %2 {
      %cst_15 = arith.constant 0.000000e+00 : f32
      %22 = vector.broadcast %cst_15 : f32 to vector<2x1xf32>
      %c0_16 = arith.constant 0 : index
      %c0_17 = arith.constant 0 : index
      %23 = vector.load %arg5[%c0_16, %c0_17] : memref<2x1xf32, #tpu.memory_space<vmem>>, vector<2x1xf32>
      tpu.vector_store %arg5[%c0_16, %c0_17], %22 {strides = array<i32>} : memref<2x1xf32, #tpu.memory_space<vmem>>, vector<2x1xf32>,
      %cst_18 = arith.constant 0.000000e+00 : f32
      %24 = vector.broadcast %cst_18 : f32 to vector<2x1xf32>
      %c0_19 = arith.constant 0 : index
      %c0_20 = arith.constant 0 : index
      %25 = vector.load %arg6[%c0_19, %c0_20] : memref<2x1xf32, #tpu.memory_space<vmem>>, vector<2x1xf32>
      tpu.vector_store %arg6[%c0_19, %c0_20], %24 {strides = array<i32>} : memref<2x1xf32, #tpu.memory_space<vmem>>, vector<2x1xf32>,
    } else {
    }
    %c0 = arith.constant 0 : index
    %c0_1 = arith.constant 0 : index
    %3 = vector.load %arg2[%c0, %c0_1] : memref<2x1024xf32, #tpu.memory_space<vmem>>, vector<2x1024xf32>
    %c0_2 = arith.constant 0 : index
    %c0_3 = arith.constant 0 : index
    %4 = vector.load %arg3[%c0_2, %c0_3] : memref<2x1024xf32, #tpu.memory_space<vmem>>, vector<2x1024xf32>
    %5 = arith.mulf %3, %3 : vector<2x1024xf32>
    %6 = arith.mulf %4, %4 : vector<2x1024xf32>
    %c0_4 = arith.constant 0 : index
    %c0_5 = arith.constant 0 : index
    %7 = vector.load %arg5[%c0_4, %c0_5] : memref<2x1xf32, #tpu.memory_space<vmem>>, vector<2x1xf32>
    %8 = arith.mulf %3, %4 : vector<2x1024xf32>
    %cst = arith.constant dense<0.000000e+00> : vector<2xf32>
    %9 = vector.multi_reduction <add>, %8, %cst [1] : vector<2x1024xf32> to vector<2xf32>
    %10 = vector.shape_cast %9 : vector<2xf32> to vector<2x1xf32>
    %11 = arith.addf %7, %10 : vector<2x1xf32>
    %c0_6 = arith.constant 0 : index
    %c0_7 = arith.constant 0 : index
    %12 = vector.load %arg5[%c0_6, %c0_7] : memref<2x1xf32, #tpu.memory_space<vmem>>, vector<2x1xf32>
    tpu.vector_store %arg5[%c0_6, %c0_7], %11 {strides = array<i32>} : memref<2x1xf32, #tpu.memory_space<vmem>>, vector<2x1xf32>,
    %c0_8 = arith.constant 0 : index
    %c0_9 = arith.constant 0 : index
    %13 = vector.load %arg6[%c0_8, %c0_9] : memref<2x1xf32, #tpu.memory_space<vmem>>, vector<2x1xf32>
    %14 = arith.addf %5, %6 : vector<2x1024xf32>
    %cst_10 = arith.constant dense<0.000000e+00> : vector<2xf32>
    %15 = vector.multi_reduction <add>, %14, %cst_10 [1] : vector<2x1024xf32> to vector<2xf32>
    %16 = vector.shape_cast %15 : vector<2xf32> to vector<2x1xf32>
    %17 = arith.addf %13, %16 : vector<2x1xf32>
    %c0_11 = arith.constant 0 : index
    %c0_12 = arith.constant 0 : index
    %18 = vector.load %arg6[%c0_11, %c0_12] : memref<2x1xf32, #tpu.memory_space<vmem>>, vector<2x1xf32>
    tpu.vector_store %arg6[%c0_11, %c0_12], %17 {strides = array<i32>} : memref<2x1xf32, #tpu.memory_space<vmem>>, vector<2x1xf32>,
    %c0_i32_13 = arith.constant 0 : i32
    %19 = arith.cmpi eq, %arg1, %c0_i32_13 : i32
    %20 = arith.extui %19 : i1 to i32
    %c0_i32_14 = arith.constant 0 : i32
    %21 = arith.cmpi ne, %20, %c0_i32_14 : i32
    scf.if %21 {
      %c0_15 = arith.constant 0 : index
      %c0_16 = arith.constant 0 : index
      %22 = vector.load %arg5[%c0_15, %c0_16] : memref<2x1xf32, #tpu.memory_space<vmem>>, vector<2x1xf32>
      %cst_17 = arith.constant 2.000000e+00 : f32
      %23 = vector.broadcast %cst_17 : f32 to vector<2x1xf32>
      %24 = arith.mulf %22, %23 : vector<2x1xf32>
      %cst_18 = arith.constant 1.000000e+00 : f32
      %25 = vector.broadcast %cst_18 : f32 to vector<2x1xf32>
      %26 = arith.addf %24, %25 : vector<2x1xf32>
      %c0_19 = arith.constant 0 : index
      %c0_20 = arith.constant 0 : index
      %27 = vector.load %arg6[%c0_19, %c0_20] : memref<2x1xf32, #tpu.memory_space<vmem>>, vector<2x1xf32>
      %cst_21 = arith.constant 1.000000e+00 : f32
      %28 = vector.broadcast %cst_21 : f32 to vector<2x1xf32>
      %29 = arith.addf %27, %28 : vector<2x1xf32>
      %30 = arith.divf %26, %29 : vector<2x1xf32>
      %cst_22 = arith.constant 1.000000e+00 : f32
      %31 = vector.broadcast %cst_22 : f32 to vector<2x1xf32>
      %32 = arith.subf %31, %30 : vector<2x1xf32>
      %33 = vector.shape_cast %32 : vector<2x1xf32> to vector<2x1xf32>
      %34 = vector.broadcast %33 : vector<2x1xf32> to vector<2x128xf32>
      %c0_23 = arith.constant 0 : index
      %c0_24 = arith.constant 0 : index
      %35 = vector.load %arg4[%c0_23, %c0_24] : memref<2x128xf32, #tpu.memory_space<vmem>>, vector<2x128xf32>
      tpu.vector_store %arg4[%c0_23, %c0_24], %34 {strides = array<i32>} : memref<2x128xf32, #tpu.memory_space<vmem>>, vector<2x128xf32>,
    } else {
    }
    return
  }
  func.func @transform_0(%arg0: i32, %arg1: i32) -> (i32, i32) {
    %c0_i32 = arith.constant 0 : i32
    return %arg0, %arg1 : i32, i32
  }
  func.func @transform_1(%arg0: i32, %arg1: i32) -> (i32, i32) {
    %c0_i32 = arith.constant 0 : i32
    return %arg0, %arg1 : i32, i32
  }
  func.func @transform_2(%arg0: i32, %arg1: i32) -> (i32, i32) {
    %c0_i32 = arith.constant 0 : i32
    %c0_i32_0 = arith.constant 0 : i32
    return %arg0, %c0_i32 : i32, i32
  }
}

</mosaic_0001>

<bundles_post_ra>
// kernel: tpu_custom_call.1
= control target key start
LH: loop header
LB: loop body
LE: loop exit
PB: predicated region body
PF: predicated region fallthrough
CT: control target
= control target key end

     0   :  { %7 = vsyncpa [#allocation5], 0  ;;  %s377_s0 = inlined_call_operand.hbm [shape: f32[2,1024], index: 0, kind: input, shape index: {}]   ;;  %s378_s1 = inlined_call_operand.hbm [shape: f32[2,1024], index: 1, kind: input, shape index: {}]   ;;  %s379_s2 = inlined_call_operand.hbm [shape: f32[2,128], index: 2, kind: output, shape index: {}]  }
   0x1   :  { %8 = vsyncpa [#allocation8], 0 }
   0x2   :  { %9 = vsyncpa [#allocation6], 0  ;;  %s300_s9 = smov [#allocation4]   ;;  %s301_s11 = smov [#allocation7]  }
   0x3   :  { %s16_s10 = sshll.u32 %s300_s9, 4  ;;  %s26_s12 = sshll.u32 %s301_s11, 4  ;;  %s17_s10 = int_to_ptr.vmem [resolvable:$true] %s16_s10  ;;  %s27_s12 = int_to_ptr.vmem [resolvable:$true] %s26_s12 }
   0x4   :  { %s228_s15 = scalar_lea.hbm %s377_s0, 256 }
   0x5   :  { %p229_p0 = scmp.ne.s32.totalorder %s377_s0, %s228_s15  ;;  %p232_p1 = scmp.lt.u32.totalorder %s228_s15, %s377_s0 }
   0x7   :  { %p234_p2 = pnand %p232_p1, %p229_p0 }
   0x9   :  { %237 = shalt.err (!%p234_p2)
}
   0xa   :  { %s238_s20 = scalar_lea.vmem %s17_s10, 256  ;;  %p243_p4 = scmp.lt.s32.totalorder %s17_s10, %s17_s10 }
   0xb   :  { %p239_p3 = scmp.ne.s32.totalorder %s17_s10, %s238_s20  ;;  %p244_p5 = scmp.lt.s32.totalorder %s238_s20, %s238_s20 }
   0xd   :  { %p245_p6 = por %p244_p5, %p243_p4 }
   0xf   :  { %p246_p7 = pnand %p245_p6, %p239_p3 }
  0x11   :  { %249 = shalt.err (!%p246_p7)
}
  0x12   :  { %19 = dma.hbm_to_vmem [thread:$0]  %s377_s0, 256, %s17_s10, [#allocation5]  }
  0x13   :  { %s250_s25 = scalar_lea.hbm %s378_s1, 256 }
  0x14   :  { %p251_p8 = scmp.ne.s32.totalorder %s378_s1, %s250_s25  ;;  %p254_p9 = scmp.lt.u32.totalorder %s250_s25, %s378_s1 }
  0x16   :  { %p256_p10 = pnand %p254_p9, %p251_p8 }
  0x18   :  { %259 = shalt.err (!%p256_p10)
}
  0x19   :  { %s260_s30 = scalar_lea.vmem %s27_s12, 256  ;;  %p265_p12 = scmp.lt.s32.totalorder %s27_s12, %s27_s12 }
  0x1a   :  { %p261_p11 = scmp.ne.s32.totalorder %s27_s12, %s260_s30  ;;  %p266_p13 = scmp.lt.s32.totalorder %s260_s30, %s260_s30 }
  0x1c   :  { %p267_p0 = por %p266_p13, %p265_p12 }
  0x1e   :  { %p268_p1 = pnand %p267_p0, %p261_p11 }
  0x20   :  { %271 = shalt.err (!%p268_p1)
}
  0x21   :  { %29 = dma.hbm_to_vmem [thread:$0]  %s378_s1, 256, %s27_s12, [#allocation8]  }
  0x22   :  { %294 = dma.done.wait [#allocation5], 256  }
  0x23   :  { %295 = vsyncadd [#allocation5], 4294967040 }
  0x24   :  { %296 = dma.done.wait [#allocation8], 256  }
  0x25   :  { %297 = vsyncadd [#allocation8], 4294967040  ;;  %v60_v0 = vlaneseq  ;;  %vm40_vm0 = vcmask 1024   ;;  %v302_v1 = vmov 1983009808   ;;  %v303_v3 = vmov 0.0  }
  0x26   :  { %v58_v2 = vunpack.c.l.s4 %v302_v1  ;;  %42 = vst.msk [vmem:[#allocation3] sm:$0x3] %vm40_vm0, %v303_v3  ;;  %41 = vst.msk [vmem:[#allocation2] sm:$0x3] %vm40_vm0, %v303_v3  ;;  %v43_v6 = vld [vmem:[#allocation4] sm:$0xff]  ;;  %v44_v7 = vld [vmem:[#allocation4 + $0x8] sm:$0xff] }
  0x27   :  { %v61_v5 = vshrl.u32 %v60_v0, 7  ;;  %v45_v8 = vld [vmem:[#allocation7] sm:$0xff]  ;;  %v46_v10 = vld [vmem:[#allocation7 + $0x8] sm:$0xff]  ;;  %v47_v11 = vmul.f32 %v43_v6, %v43_v6  ;;  %v48_v12 = vmul.f32 %v44_v7, %v44_v7  ;;  %vm98_vm1 = vcmask 1041408   ;;  %s305_s1 = smov [#allocation9]  }
  0x28   :  { %v59_v4 = vunpack.c.0.s8 %v58_v2  ;;  %v49_v13 = vmul.f32 %v45_v8, %v45_v8  ;;  %v52_v14 = vmul.f32 %v45_v8, %v43_v6  ;;  %v50_v15 = vmul.f32 %v46_v10, %v46_v10  ;;  %s208_s4 = sshll.u32 %s305_s1, 4  ;;  %s209_s4 = int_to_ptr.vmem [resolvable:$true] %s208_s4 }
  0x29   :  { %v53_v20 = vmul.f32 %v46_v10, %v44_v7  ;;  %s272_s5 = scalar_lea.vmem %s209_s4, 32  ;;  %p277_p3 = scmp.lt.s32.totalorder %s209_s4, %s209_s4 }
  0x2a   :  { %v62_v9 = vsub.s32 %v59_v4, %v61_v5  ;;  %v120_v16 = vadd.f32 %v49_v13, %v47_v11  ;;  %v56_v17 = vcombine.high %v52_v14, %v52_v14  ;;  %v121_v19 = vadd.f32 %v50_v15, %v48_v12  ;;  %p273_p2 = scmp.ne.s32.totalorder %s209_s4, %s272_s5  ;;  %p278_p4 = scmp.lt.s32.totalorder %s272_s5, %s272_s5 }
  0x2b   :  { %v73_v31 = vcombine.high %v53_v20, %v53_v20  ;;  %v304_v5 = vmov 0  }
  0x2c   :  { %v63_v18 = vrot.slane %v52_v14, %v62_v9  ;;  %v124_v21 = vcombine.high %v120_v16, %v120_v16  ;;  %v131_v22 = vrot.slane %v120_v16, %v62_v9  ;;  %v70_v23 = vrot.slane %v56_v17, %v62_v9  ;;  %224 = vset.pattern.permute.xlu1 %v304_v5  ;;  %p279_p5 = por %p278_p4, %p277_p3 }
  0x2d   :  { %v141_v24 = vcombine.high %v121_v19, %v121_v19  ;;  %v148_v28 = vrot.slane %v121_v19, %v62_v9  ;;  %v80_v32 = vrot.slane %v53_v20, %v62_v9  ;;  %v87_v46 = vrot.slane %v73_v31, %v62_v9  ;;  %225 = vset.pattern.permute.xlu0 %v304_v5  ;;  %v119_v6 = vld [vmem:[#allocation3] sm:$0x3] }
  0x2e   :  { %v71_v25 = vcombine.high %v63_v18, %v63_v18  ;;  %v138_v26 = vrot.slane %v124_v21, %v62_v9  ;;  %v139_v27 = vcombine.high %v131_v22, %v131_v22  ;;  %v166_v29 = vsel %vm98_vm1, %v131_v22, 0.0  ;;  %p280_p6 = pnand %p279_p5, %p273_p2 }
  0x2f   :  { %v72_v30 = vcombine.high %v70_v23, %v70_v23  ;;  %v99_v36 = vsel %vm98_vm1, %v63_v18, 0.0  ;;  %v155_v37 = vrot.slane %v141_v24, %v62_v9  ;;  %v156_v39 = vcombine.high %v148_v28, %v148_v28  ;;  %v51_v9 = vld [vmem:[#allocation2] sm:$0x3] }
  0x30   :  { %v140_v33 = vcombine.high %v138_v26, %v138_v26  ;;  %v167_v34 = vsel %vm98_vm1, %v139_v27, 0.0  ;;  %v169_v35 = vsel %vm98_vm1, %v138_v26, 0.0  ;;  %v100_v41 = vsel %vm98_vm1, %v71_v25, 0.0 }
  0x31   :  { %v168_v38 = vadd.f32 %v167_v34, %v166_v29  ;;  %v102_v42 = vsel %vm98_vm1, %v70_v23, 0.0  ;;  %v101_v44 = vadd.f32 %v100_v41, %v99_v36  ;;  %v173_v45 = vsel %vm98_vm1, %v148_v28, 0.0 }
  0x32   :  { %v171_v40 = vsel %vm98_vm1, %v140_v33, 0.0  ;;  %v88_v47 = vcombine.high %v80_v32, %v80_v32  ;;  %v104_v48 = vsel %vm98_vm1, %v72_v30, 0.0  ;;  %v157_v51 = vcombine.high %v155_v37, %v155_v37 }
  0x33   :  { %v170_v43 = vadd.f32 %v169_v35, %v168_v38  ;;  %v103_v50 = vadd.f32 %v102_v42, %v101_v44  ;;  %v175_v52 = vsel %vm98_vm1, %v156_v39, 0.0  ;;  %v106_v53 = vsel %vm98_vm1, %v80_v32, 0.0 }
  0x34   :  { %v177_v56 = vsel %vm98_vm1, %v155_v37, 0.0  ;;  %v89_v57 = vcombine.high %v87_v46, %v87_v46  ;;  %v108_v58 = vsel %vm98_vm1, %v88_v47, 0.0  ;;  %v179_v61 = vsel %vm98_vm1, %v157_v51, 0.0 }
  0x35   :  { %v172_v49 = vadd.f32 %v171_v40, %v170_v43  ;;  %v105_v55 = vadd.f32 %v104_v48, %v103_v50  ;;  %v110_v62 = vsel %vm98_vm1, %v87_v46, 0.0 }
  0x36   :  { %v112_v1 = vsel %vm98_vm1, %v89_v57, 0.0 }
  0x37   :  { %v174_v54 = vadd.f32 %v173_v45, %v172_v49  ;;  %v107_v60 = vadd.f32 %v106_v53, %v105_v55 }
  0x39   :  { %v176_v59 = vadd.f32 %v175_v52, %v174_v54  ;;  %v109_v0 = vadd.f32 %v108_v58, %v107_v60 }
  0x3b   :  { %v178_v63 = vadd.f32 %v177_v56, %v176_v59  ;;  %v111_v3 = vadd.f32 %v110_v62, %v109_v0 }
  0x3d   :  { %v180_v2 = vadd.f32 %v179_v61, %v178_v63  ;;  %v113_v4 = vadd.f32 %v112_v1, %v111_v3 }
  0x3f   :  { %181 = vadd.xlane.f32.xlu0 %v180_v2 }
  0x43   :  { %114 = vadd.xlane.f32.xlu0 %v113_v4 }
  0xcc   :  { %v182_v7 = vpop.xlane.xlu0 %181 }
  0xcd   :  { %v183_v8 = vadd.f32 %v182_v7, %v119_v6 }
  0xcf   :  { %184 = vst.msk [vmem:[#allocation3] sm:$0x3] %vm40_vm0, %v183_v8 }
  0xd0   :  { %v115_v10 = vpop.xlane.xlu0 %114 }
  0xd1   :  { %v116_v11 = vadd.f32 %v115_v10, %v51_v9 }
  0xd3   :  { %118 = vst.msk [vmem:[#allocation2] sm:$0x3] %vm40_vm0, %v116_v11 }
  0xd6   :  { %v191_v12 = vld [vmem:[#allocation3] sm:$0x3] }
  0xd7   :  { %v192_v13 = vadd.f32 1.0, %v191_v12 }
  0xd9   :  { %226 = vrcp.f32 %v192_v13 }
  0xda   :  { %v188_v14 = vld [vmem:[#allocation2] sm:$0x3] }
  0xdb   :  { %v189_v15 = vmul.f32 2.0, %v188_v14 }
  0xdd   :  { %v190_v16 = vadd.f32 1.0, %v189_v15 }
  0xe3   :  { %v227_v17 = vpop.eup %226 }
  0xe4   :  { %v194_v18 = vmul.f32 %v227_v17, %v190_v16 }
  0xe6   :  { %v195_v19 = vsub.f32 1.0, %v194_v18 }
  0xe8   :  { %198 = vperm.xlu1 %224, %v195_v19  }
 0x167   :  { %v199_v20 = vpop.permute.xlu1 %198 }
 0x168   :  { %201 = vst [vmem:[#allocation9] sm:$0x3] %v199_v20 }
 0x169   :  { %283 = shalt.err (!%p280_p6)
}
 0x16a   :  { %s284_s8 = scalar_lea.hbm %s379_s2, 32 }
 0x16b   :  { %p285_p7 = scmp.ne.s32.totalorder %s379_s2, %s284_s8  ;;  %p288_p8 = scmp.lt.u32.totalorder %s284_s8, %s379_s2 }
 0x16d   :  { %p290_p9 = pnand %p288_p8, %p285_p7 }
 0x16f   :  { %293 = shalt.err (!%p290_p9)
}
 0x170   :  { %211 = dma.vmem_to_hbm [thread:$0]  %s209_s4, 32, %s379_s2, [#allocation6]  }
 0x171   :  { %298 = dma.done.wait [#allocation6], 32  }
 0x172   :  { %299 = vsyncadd [#allocation6], 4294967264 }
 0x173   :  { %215 = vsyncpa [#allocation5], 1 }
 0x174   :  { %216 = vsyncpa [#allocation8], 1 }
 0x175   :  { %217 = vsyncpa [#allocation6], 1 }

</bundles_post_ra>
